<compile_context>
chip_gen: v6e
topology: v6e:2x2x1
jax: 0.10.0
libtpu: 0.0.40
codegen_flags: <defaults>
</compile_context>

<pallas_src>
import functools

import numpy as np
import jax
import jax.numpy as jnp
from jax.experimental import pallas as pl
from jax.experimental.pallas import tpu as pltpu


def _cnn_encoder_kernel(x_ref, w1_ref, b1_ref, w2_ref, b2_ref, out_ref, *, blk):
    """Fused Conv1d + bias + MaxPool1d(2) + ReLU + Linear on one N-tile.

    x_ref:   (bn, C*L)       input rows, flattened channel-major (free reshape, no concat)
    w1_ref:  (C*L, 2*blk)    block-Toeplitz conv weight (timestep t lives in lanes [t*blk, t*blk+K))
    b1_ref:  (1, 2*blk) f32  conv bias replicated into both timestep blocks (0 in padded lanes)
    w2_ref:  (blk, 128)      fc weight (0 in padded rows)
    b2_ref:  (1, 128)   f32  fc bias
    out_ref: (bn, 128)
    """
    # Conv1d for both pooled timesteps in one MXU matmul; bias added on the f32 accumulator
    # (the broadcast add rides idle VALU slots -- this kernel is DMA / step-overhead bound).
    raw = jnp.dot(x_ref[...], w1_ref[...], preferred_element_type=jnp.float32) + b1_ref[...]
    # MaxPool1d(2) over the two lane-aligned timestep blocks, then a single ReLU
    # (pool-then-relu == relu-then-pool for max pooling).  Padded lanes stay exactly 0.
    pooled = jnp.maximum(jnp.maximum(raw[:, :blk], raw[:, blk:]), 0.0)
    # Fully-connected layer.
    out_ref[...] = (jnp.dot(pooled, w2_ref[...], preferred_element_type=jnp.float32)
                    + b2_ref[...]).astype(out_ref.dtype)


def _pack_weights(w_conv, b_conv, w_fc, b_fc, seq_len, param_dtype):
    """One-time (numpy, host-side) expansion of module parameters into the fused operands."""
    w_conv = np.asarray(w_conv, np.float32)
    b_conv = np.asarray(b_conv, np.float32)
    w_fc = np.asarray(w_fc, np.float32)
    b_fc = np.asarray(b_fc, np.float32)
    k, c, ks = w_conv.shape
    out_dim = w_fc.shape[0]
    blk = max(128, -(-k // 128) * 128)            # per-timestep lane block (>= K), lane-aligned

    w1 = np.zeros((c * seq_len, 2 * blk), np.float32)
    b1 = np.zeros((1, 2 * blk), np.float32)
    for t in range(2):                            # only timesteps 0,1 survive MaxPool1d(2)
        col0 = t * blk
        for j in range(ks):
            for ci in range(c):
                w1[ci * seq_len + t + j, col0:col0 + k] = w_conv[:, ci, j]
        b1[0, col0:col0 + k] = b_conv

    w2 = np.zeros((blk, out_dim), np.float32)
    w2[:k, :] = w_fc.T
    b2 = b_fc.reshape(1, out_dim)

    return (jnp.asarray(w1, dtype=param_dtype), jnp.asarray(b1, dtype=jnp.float32),
            jnp.asarray(w2, dtype=param_dtype), jnp.asarray(b2, dtype=jnp.float32), blk)


def _choose_block_n(n, block_n):
    """N-tile size: large tiles amortize the ~0.35us/step grid overhead, but keep >= 2 grid
    steps once there is enough work so v7x can shard the 'parallel' axis across both TCs."""
    if n <= 8:
        return n                                  # single tile covering the whole array
    bn = min(block_n, -(-n // 2))                 # at least 2 grid steps
    return max(8, (bn // 8) * 8)                  # sublane-aligned


def make_cnn_encoder(w_conv, b_conv, w_fc, b_fc, seq_len, *,
                     block_n=4096, param_dtype=jnp.float32, out_dtype=jnp.float32):
    """Build the fused encoder.  Weight packing happens ONCE here (hoisted out of forward).

    w_conv: (K, C, ks); b_conv: (K,); w_fc: (128, K); b_fc: (128,).
    On v6e/v7x pass param_dtype=jnp.bfloat16 (and optionally out_dtype=jnp.bfloat16) to halve
    HBM traffic; accumulation stays f32.
    """
    k, c, ks = w_conv.shape
    l_out = seq_len - ks + 1
    n_pool = l_out // 2
    # Linear(num_kernels, 128) after flatten(start_dim=1) is only shape-consistent when the
    # pooled length is exactly 1 (as in the original module for its intended shapes).
    assert n_pool == 1 and w_fc.shape[1] == k, (
        "Linear(num_kernels, 128) after flatten requires pooled length == 1")
    out_dim = w_fc.shape[0]
    c_l = c * seq_len

    w1, b1, w2, b2, blk = _pack_weights(w_conv, b_conv, w_fc, b_fc, seq_len, param_dtype)
    weight_bytes = int(w1.nbytes + b1.nbytes + w2.nbytes + b2.nbytes)
    kernel = functools.partial(_cnn_encoder_kernel, blk=blk)
    in_itemsize = jnp.dtype(param_dtype).itemsize
    out_itemsize = jnp.dtype(out_dtype).itemsize
    lane_pad = lambda v: -(-v // 128) * 128

    def forward(x):
        n = x.shape[0]
        assert x.shape == (n, c, seq_len), x.shape
        # Free reshape (contiguous NCL layout) -- no x_aug concatenate / no extra HBM copy of x.
        x_flat = x.reshape(n, c_l).astype(param_dtype)

        bn = _choose_block_n(n, block_n)
        grid = (pl.cdiv(n, bn),)

        # Advisory cost for the XLA scheduler around the custom call.
        cost = pl.CostEstimate(
            flops=2 * n * c_l * (2 * blk) + 2 * n * blk * out_dim,
            transcendentals=0,
            bytes_accessed=int(n * c_l * in_itemsize + weight_bytes
                               + n * out_dim * out_itemsize))

        # VMEM footprint: double-buffered x tile (lane-padded to 128) + double-buffered out tile
        # + resident weights.  Raise the scoped-VMEM limit only when the default (16 MiB on v5e)
        # would be exceeded, so the same code scales block_n uniformly across generations.
        vmem_est = (2 * bn * lane_pad(c_l) * in_itemsize
                    + 2 * bn * lane_pad(out_dim) * out_itemsize
                    + weight_bytes + (1 << 20))
        compiler_params = pltpu.CompilerParams(
            dimension_semantics=("parallel",),
            vmem_limit_bytes=(min(int(vmem_est), 100 << 20)
                              if vmem_est > (16 << 20) else None))

        def run(weight_pipeline_mode):
            extra = ({} if weight_pipeline_mode is None
                     else {"pipeline_mode": weight_pipeline_mode})
            const_spec = lambda shape: pl.BlockSpec(shape, lambda i: (0, 0), **extra)
            return pl.pallas_call(
                kernel,
                out_shape=jax.ShapeDtypeStruct((n, out_dim), out_dtype),
                grid=grid,
                in_specs=[
                    pl.BlockSpec((bn, c_l), lambda i: (i, 0)),      # x: tiled over N
                    const_spec(w1.shape),                           # weights stay resident
                    const_spec(b1.shape),
                    const_spec(w2.shape),
                    const_spec(b2.shape),
                ],
                out_specs=pl.BlockSpec((bn, out_dim), lambda i: (i, 0)),
                compiler_params=compiler_params,
                cost_estimate=cost,
            )(x_flat, w1, b1, w2, b2)

        try:
            # Single-buffer the grid-invariant weight operands (they never change per step).
            return run(pl.Buffered(1))
        except Exception:
            # Older/stricter JAX builds: fall back to default (double-buffered) weight specs.
            return run(None)

    return forward


def cnn_encoder_forward(x, w_conv, b_conv, w_fc, b_fc, **kwargs):
    """Convenience one-shot wrapper (packs weights on every call; prefer make_cnn_encoder)."""
    return make_cnn_encoder(w_conv, b_conv, w_fc, b_fc, x.shape[-1], **kwargs)(x)


def _reference_forward(x, w_conv, b_conv, w_fc, b_fc):
    """Pure-JAX reference reproducing the PyTorch forward semantics."""
    n, c, l = x.shape
    k, _, ks = w_conv.shape
    l_out = l - ks + 1
    conv = jnp.stack(
        [jnp.einsum('ncj,kcj->nk', x[:, :, t:t + ks], w_conv) for t in range(l_out)],
        axis=-1) + b_conv[None, :, None]                       # (N, K, L_out)
    conv = jnp.maximum(conv, 0.0)
    p = l_out // 2
    pooled = jnp.max(conv[:, :, :2 * p].reshape(n, k, p, 2), axis=-1)   # (N, K, P)
    flat = pooled.reshape(n, k * p)                            # torch.flatten(start_dim=1)
    return flat @ w_fc.T + b_fc


if __name__ == "__main__":
    # Shapes consistent with the module: input_dim=4, num_kernels=32, kernel_size=3,
    # seq len L=4  =>  conv len 2, pooled len 1, fc 32->128.
    batch, input_dim, seq_len = 2, 4, 4
    num_kernels, kernel_size, fc_out = 32, 3, 128

    key = jax.random.PRNGKey(0)
    kx, kwc, kbc, kwf, kbf = jax.random.split(key, 5)

    x = jax.random.normal(kx, (batch, input_dim, seq_len), jnp.float32)
    w_conv = 0.1 * jax.random.normal(kwc, (num_kernels, input_dim, kernel_size), jnp.float32)
    b_conv = 0.1 * jax.random.normal(kbc, (num_kernels,), jnp.float32)
    w_fc = 0.1 * jax.random.normal(kwf, (fc_out, num_kernels), jnp.float32)
    b_fc = 0.1 * jax.random.normal(kbf, (fc_out,), jnp.float32)

    ref = _reference_forward(x, w_conv, b_conv, w_fc, b_fc)

    # 1) f32 path (exact parity with the f32 reference).  Weights packed once.
    encoder = make_cnn_encoder(w_conv, b_conv, w_fc, b_fc, seq_len)
    out = jax.block_until_ready(encoder(x))
    assert out.shape == (batch, fc_out), out.shape
    assert jnp.allclose(out, ref, atol=1e-4, rtol=1e-4), "f32 mismatch vs reference"

    # 2) Multi-block grid with a partial final N-tile (exercises the tiled / parallel path).
    n2 = 10
    x2 = jax.random.normal(jax.random.PRNGKey(1), (n2, input_dim, seq_len), jnp.float32)
    encoder_tiled = make_cnn_encoder(w_conv, b_conv, w_fc, b_fc, seq_len, block_n=8)
    out2 = jax.block_until_ready(encoder_tiled(x2))
    ref2 = _reference_forward(x2, w_conv, b_conv, w_fc, b_fc)
    assert jnp.allclose(out2, ref2, atol=1e-4, rtol=1e-4), "tiled mismatch vs reference"

    # 3) bf16 I/O path (v6e/v7x recommendation): bf16 inputs/weights, f32 accumulation.
    encoder_bf16 = make_cnn_encoder(w_conv, b_conv, w_fc, b_fc, seq_len,
                                    param_dtype=jnp.bfloat16)
    out3 = jax.block_until_ready(encoder_bf16(x))
    assert jnp.allclose(out3, ref, atol=5e-2, rtol=5e-2), "bf16 drift too large"

    print("KERNEL_OK")
</pallas_src>

<mosaic_0001>
module attributes {stable_mosaic.version = 11 : i64} {
  func.func @_cnn_encoder_kernel(%arg0: i32, %arg1: memref<2x16xf32, #tpu.memory_space<vmem>>, %arg2: memref<16x256xf32, #tpu.memory_space<vmem>>, %arg3: memref<1x256xf32, #tpu.memory_space<vmem>>, %arg4: memref<128x128xf32, #tpu.memory_space<vmem>>, %arg5: memref<1x128xf32, #tpu.memory_space<vmem>>, %arg6: memref<2x128xf32, #tpu.memory_space<vmem>>) attributes {dimension_semantics = [#tpu.dimension_semantics<parallel>], iteration_bounds = array<i64: 1>, scalar_prefetch = 0 : i64, scratch_operands = 0 : i64, tpu.core_type = #tpu.core_type<tc>, window_params = [{transform_indices = @transform_0, window_bounds = array<i64: 2, 16>}, {pipeline_mode = #tpu.pipeline_mode<synchronous>, transform_indices = @transform_1, window_bounds = array<i64: 16, 256>}, {pipeline_mode = #tpu.pipeline_mode<synchronous>, transform_indices = @transform_2, window_bounds = array<i64: 1, 256>}, {pipeline_mode = #tpu.pipeline_mode<synchronous>, transform_indices = @transform_3, window_bounds = array<i64: 128, 128>}, {pipeline_mode = #tpu.pipeline_mode<synchronous>, transform_indices = @transform_4, window_bounds = array<i64: 1, 128>}, {transform_indices = @transform_5, window_bounds = array<i64: 2, 128>}]} {
    %c0 = arith.constant 0 : index
    %c0_0 = arith.constant 0 : index
    %0 = vector.load %arg1[%c0, %c0_0] : memref<2x16xf32, #tpu.memory_space<vmem>>, vector<2x16xf32>
    %c0_1 = arith.constant 0 : index
    %c0_2 = arith.constant 0 : index
    %1 = vector.load %arg2[%c0_1, %c0_2] : memref<16x256xf32, #tpu.memory_space<vmem>>, vector<16x256xf32>
    %cst = arith.constant dense<0.000000e+00> : vector<2x256xf32>
    %2 = tpu.matmul %0, %1, %cst {dimension_numbers = #tpu.dot_dimension_numbers<[1], [0], [0], [1], [0, 0, 1, 1], [], []>} : vector<2x16xf32>, vector<16x256xf32>, vector<2x256xf32> -> vector<2x256xf32>
    %c0_3 = arith.constant 0 : index
    %c0_4 = arith.constant 0 : index
    %3 = vector.load %arg3[%c0_3, %c0_4] : memref<1x256xf32, #tpu.memory_space<vmem>>, vector<1x256xf32>
    %4 = vector.broadcast %3 : vector<1x256xf32> to vector<2x256xf32>
    %5 = arith.addf %2, %4 : vector<2x256xf32>
    %6 = vector.extract_strided_slice %5 {offsets = [0, 0], sizes = [2, 128], strides = [1, 1]} : vector<2x256xf32> to vector<2x128xf32>
    %7 = vector.extract_strided_slice %5 {offsets = [0, 128], sizes = [2, 128], strides = [1, 1]} : vector<2x256xf32> to vector<2x128xf32>
    %8 = arith.maximumf %6, %7 : vector<2x128xf32>
    %cst_5 = arith.constant 0.000000e+00 : f32
    %9 = vector.broadcast %cst_5 : f32 to vector<2x128xf32>
    %10 = arith.maximumf %8, %9 : vector<2x128xf32>
    %c0_6 = arith.constant 0 : index
    %c0_7 = arith.constant 0 : index
    %11 = vector.load %arg4[%c0_6, %c0_7] : memref<128x128xf32, #tpu.memory_space<vmem>>, vector<128x128xf32>
    %cst_8 = arith.constant dense<0.000000e+00> : vector<2x128xf32>
    %12 = tpu.matmul %10, %11, %cst_8 {dimension_numbers = #tpu.dot_dimension_numbers<[1], [0], [0], [1], [0, 0, 1, 1], [], []>} : vector<2x128xf32>, vector<128x128xf32>, vector<2x128xf32> -> vector<2x128xf32>
    %c0_9 = arith.constant 0 : index
    %c0_10 = arith.constant 0 : index
    %13 = vector.load %arg5[%c0_9, %c0_10] : memref<1x128xf32, #tpu.memory_space<vmem>>, vector<1x128xf32>
    %14 = vector.broadcast %13 : vector<1x128xf32> to vector<2x128xf32>
    %15 = arith.addf %12, %14 : vector<2x128xf32>
    %c0_11 = arith.constant 0 : index
    %c0_12 = arith.constant 0 : index
    %16 = vector.load %arg6[%c0_11, %c0_12] : memref<2x128xf32, #tpu.memory_space<vmem>>, vector<2x128xf32>
    tpu.vector_store %arg6[%c0_11, %c0_12], %15 {strides = array<i32>} : memref<2x128xf32, #tpu.memory_space<vmem>>, vector<2x128xf32>,
    return
  }
  func.func @transform_0(%arg0: i32) -> (i32, i32) {
    %c0_i32 = arith.constant 0 : i32
    %c0_i32_0 = arith.constant 0 : i32
    return %arg0, %c0_i32 : i32, i32
  }
  func.func @transform_1(%arg0: i32) -> (i32, i32) {
    %c0_i32 = arith.constant 0 : i32
    %c0_i32_0 = arith.constant 0 : i32
    %c0_i32_1 = arith.constant 0 : i32
    return %c0_i32, %c0_i32_0 : i32, i32
  }
  func.func @transform_2(%arg0: i32) -> (i32, i32) {
    %c0_i32 = arith.constant 0 : i32
    %c0_i32_0 = arith.constant 0 : i32
    %c0_i32_1 = arith.constant 0 : i32
    return %c0_i32, %c0_i32_0 : i32, i32
  }
  func.func @transform_3(%arg0: i32) -> (i32, i32) {
    %c0_i32 = arith.constant 0 : i32
    %c0_i32_0 = arith.constant 0 : i32
    %c0_i32_1 = arith.constant 0 : i32
    return %c0_i32, %c0_i32_0 : i32, i32
  }
  func.func @transform_4(%arg0: i32) -> (i32, i32) {
    %c0_i32 = arith.constant 0 : i32
    %c0_i32_0 = arith.constant 0 : i32
    %c0_i32_1 = arith.constant 0 : i32
    return %c0_i32, %c0_i32_0 : i32, i32
  }
  func.func @transform_5(%arg0: i32) -> (i32, i32) {
    %c0_i32 = arith.constant 0 : i32
    %c0_i32_0 = arith.constant 0 : i32
    return %arg0, %c0_i32 : i32, i32
  }
}

module attributes {stable_mosaic.version = 11 : i64} {
  func.func @_cnn_encoder_kernel(%arg0: i32, %arg1: memref<2x16xf32, #tpu.memory_space<vmem>>, %arg2: memref<16x256xf32, #tpu.memory_space<vmem>>, %arg3: memref<1x256xf32, #tpu.memory_space<vmem>>, %arg4: memref<128x128xf32, #tpu.memory_space<vmem>>, %arg5: memref<1x128xf32, #tpu.memory_space<vmem>>, %arg6: memref<2x128xf32, #tpu.memory_space<vmem>>) attributes {dimension_semantics = [#tpu.dimension_semantics<parallel>], iteration_bounds = array<i64: 1>, scalar_prefetch = 0 : i64, scratch_operands = 0 : i64, tpu.core_type = #tpu.core_type<tc>, window_params = [{transform_indices = @transform_0, window_bounds = array<i64: 2, 16>}, {pipeline_mode = #tpu.pipeline_mode<synchronous>, transform_indices = @transform_1, window_bounds = array<i64: 16, 256>}, {pipeline_mode = #tpu.pipeline_mode<synchronous>, transform_indices = @transform_2, window_bounds = array<i64: 1, 256>}, {pipeline_mode = #tpu.pipeline_mode<synchronous>, transform_indices = @transform_3, window_bounds = array<i64: 128, 128>}, {pipeline_mode = #tpu.pipeline_mode<synchronous>, transform_indices = @transform_4, window_bounds = array<i64: 1, 128>}, {transform_indices = @transform_5, window_bounds = array<i64: 2, 128>}]} {
    %c0 = arith.constant 0 : index
    %c0_0 = arith.constant 0 : index
    %0 = vector.load %arg1[%c0, %c0_0] : memref<2x16xf32, #tpu.memory_space<vmem>>, vector<2x16xf32>
    %c0_1 = arith.constant 0 : index
    %c0_2 = arith.constant 0 : index
    %1 = vector.load %arg2[%c0_1, %c0_2] : memref<16x256xf32, #tpu.memory_space<vmem>>, vector<16x256xf32>
    %cst = arith.constant dense<0.000000e+00> : vector<2x256xf32>
    %2 = tpu.matmul %0, %1, %cst {dimension_numbers = #tpu.dot_dimension_numbers<[1], [0], [0], [1], [0, 0, 1, 1], [], []>} : vector<2x16xf32>, vector<16x256xf32>, vector<2x256xf32> -> vector<2x256xf32>
    %c0_3 = arith.constant 0 : index
    %c0_4 = arith.constant 0 : index
    %3 = vector.load %arg3[%c0_3, %c0_4] : memref<1x256xf32, #tpu.memory_space<vmem>>, vector<1x256xf32>
    %4 = vector.broadcast %3 : vector<1x256xf32> to vector<2x256xf32>
    %5 = arith.addf %2, %4 : vector<2x256xf32>
    %6 = vector.extract_strided_slice %5 {offsets = [0, 0], sizes = [2, 128], strides = [1, 1]} : vector<2x256xf32> to vector<2x128xf32>
    %7 = vector.extract_strided_slice %5 {offsets = [0, 128], sizes = [2, 128], strides = [1, 1]} : vector<2x256xf32> to vector<2x128xf32>
    %8 = arith.maximumf %6, %7 : vector<2x128xf32>
    %cst_5 = arith.constant 0.000000e+00 : f32
    %9 = vector.broadcast %cst_5 : f32 to vector<2x128xf32>
    %10 = arith.maximumf %8, %9 : vector<2x128xf32>
    %c0_6 = arith.constant 0 : index
    %c0_7 = arith.constant 0 : index
    %11 = vector.load %arg4[%c0_6, %c0_7] : memref<128x128xf32, #tpu.memory_space<vmem>>, vector<128x128xf32>
    %cst_8 = arith.constant dense<0.000000e+00> : vector<2x128xf32>
    %12 = tpu.matmul %10, %11, %cst_8 {dimension_numbers = #tpu.dot_dimension_numbers<[1], [0], [0], [1], [0, 0, 1, 1], [], []>} : vector<2x128xf32>, vector<128x128xf32>, vector<2x128xf32> -> vector<2x128xf32>
    %c0_9 = arith.constant 0 : index
    %c0_10 = arith.constant 0 : index
    %13 = vector.load %arg5[%c0_9, %c0_10] : memref<1x128xf32, #tpu.memory_space<vmem>>, vector<1x128xf32>
    %14 = vector.broadcast %13 : vector<1x128xf32> to vector<2x128xf32>
    %15 = arith.addf %12, %14 : vector<2x128xf32>
    %c0_11 = arith.constant 0 : index
    %c0_12 = arith.constant 0 : index
    %16 = vector.load %arg6[%c0_11, %c0_12] : memref<2x128xf32, #tpu.memory_space<vmem>>, vector<2x128xf32>
    tpu.vector_store %arg6[%c0_11, %c0_12], %15 {strides = array<i32>} : memref<2x128xf32, #tpu.memory_space<vmem>>, vector<2x128xf32>,
    return
  }
  func.func @transform_0(%arg0: i32) -> (i32, i32) {
    %c0_i32 = arith.constant 0 : i32
    %c0_i32_0 = arith.constant 0 : i32
    return %arg0, %c0_i32 : i32, i32
  }
  func.func @transform_1(%arg0: i32) -> (i32, i32) {
    %c0_i32 = arith.constant 0 : i32
    %c0_i32_0 = arith.constant 0 : i32
    %c0_i32_1 = arith.constant 0 : i32
    return %c0_i32, %c0_i32_0 : i32, i32
  }
  func.func @transform_2(%arg0: i32) -> (i32, i32) {
    %c0_i32 = arith.constant 0 : i32
    %c0_i32_0 = arith.constant 0 : i32
    %c0_i32_1 = arith.constant 0 : i32
    return %c0_i32, %c0_i32_0 : i32, i32
  }
  func.func @transform_3(%arg0: i32) -> (i32, i32) {
    %c0_i32 = arith.constant 0 : i32
    %c0_i32_0 = arith.constant 0 : i32
    %c0_i32_1 = arith.constant 0 : i32
    return %c0_i32, %c0_i32_0 : i32, i32
  }
  func.func @transform_4(%arg0: i32) -> (i32, i32) {
    %c0_i32 = arith.constant 0 : i32
    %c0_i32_0 = arith.constant 0 : i32
    %c0_i32_1 = arith.constant 0 : i32
    return %c0_i32, %c0_i32_0 : i32, i32
  }
  func.func @transform_5(%arg0: i32) -> (i32, i32) {
    %c0_i32 = arith.constant 0 : i32
    %c0_i32_0 = arith.constant 0 : i32
    return %arg0, %c0_i32 : i32, i32
  }
}

</mosaic_0001>

<bundles_post_ra>
// kernel: tpu_custom_call.1
= control target key start
LH: loop header
LB: loop body
LE: loop exit
PB: predicated region body
PF: predicated region fallthrough
CT: control target
= control target key end

     0   :  { %10 = vsyncpa [#allocation3], 0  ;;  %s472_s0 = inlined_call_operand.hbm [shape: f32[2,16], index: 0, kind: input, shape index: {}]   ;;  %s473_s1 = inlined_call_operand.hbm [shape: f32[16,256], index: 1, kind: input, shape index: {}]   ;;  %s474_s2 = inlined_call_operand.vmem [shape: f32[1,256], index: 2, kind: input, shape index: {}]   ;;  %s475_s3 = inlined_call_operand.hbm [shape: f32[128,128], index: 3, kind: input, shape index: {}]   ;;  %s476_s4 = inlined_call_operand.vmem [shape: f32[1,128], index: 4, kind: input, shape index: {}]   ;;  %s477_s5 = inlined_call_operand.hbm [shape: f32[2,128], index: 5, kind: output, shape index: {}]  }
   0x1   :  { %11 = vsyncpa [#allocation6], 0 }
   0x2   :  { %12 = vsyncpa [#allocation4], 0  ;;  %s414_s18 = smov [#allocation5]  }
   0x3   :  { %s28_s19 = sshll.u32 %s414_s18, 4  ;;  %s29_s19 = int_to_ptr.vmem [resolvable:$true] %s28_s19 }
   0x4   :  { %s336_s20 = scalar_lea.vmem %s29_s19, 512  ;;  %p341_p1 = scmp.lt.s32.totalorder %s29_s19, %s29_s19 }
   0x5   :  { %p337_p0 = scmp.ne.s32.totalorder %s29_s19, %s336_s20  ;;  %p342_p2 = scmp.lt.s32.totalorder %s336_s20, %s336_s20 }
   0x7   :  { %p343_p3 = por %p342_p2, %p341_p1 }
   0x9   :  { %p344_p4 = pnand %p343_p3, %p337_p0 }
   0xb   :  { %347 = shalt.err (!%p344_p4)
}
   0xc   :  { %s415_s21 = smov 256   ;;  %s416_s22 = smov 16  }
   0xd   :  { %34 = dma.hbm_to_vmem [thread:$0]  %s473_s1, 512, %s29_s19, [#allocation6], %s415_s21, %s415_s21, %s416_s22  }
   0xe   :  { %s417_s25 = smov [#allocation2]   ;;  %s418_s27 = smov [#allocation7]  }
   0xf   :  { %s19_s26 = sshll.u32 %s417_s25, 4  ;;  %s42_s28 = sshll.u32 %s418_s27, 4  ;;  %s20_s26 = int_to_ptr.vmem [resolvable:$true] %s19_s26  ;;  %s43_s28 = int_to_ptr.vmem [resolvable:$true] %s42_s28 }
  0x10   :  { %s356_s29 = scalar_lea.vmem %s20_s26, 32  ;;  %p361_p6 = scmp.lt.s32.totalorder %s20_s26, %s20_s26 }
  0x11   :  { %p357_p5 = scmp.ne.s32.totalorder %s20_s26, %s356_s29  ;;  %p362_p7 = scmp.lt.s32.totalorder %s356_s29, %s356_s29 }
  0x13   :  { %p363_p8 = por %p362_p7, %p361_p6 }
  0x15   :  { %p364_p9 = pnand %p363_p8, %p357_p5 }
  0x17   :  { %367 = shalt.err (!%p364_p9)
}
  0x18   :  { %22 = dma.hbm_to_vmem [thread:$0]  %s472_s0, 32, %s20_s26, [#allocation3]  }
  0x19   :  { %s376_s7 = scalar_lea.vmem %s43_s28, 2048  ;;  %p381_p11 = scmp.lt.s32.totalorder %s43_s28, %s43_s28 }
  0x1a   :  { %p377_p10 = scmp.ne.s32.totalorder %s43_s28, %s376_s7  ;;  %p382_p12 = scmp.lt.s32.totalorder %s376_s7, %s376_s7 }
  0x1c   :  { %p383_p13 = por %p382_p12, %p381_p11 }
  0x1e   :  { %p384_p0 = pnand %p383_p13, %p377_p10 }
  0x20   :  { %387 = shalt.err (!%p384_p0)
}
  0x21   :  { %s419_s1 = smov 128   ;;  %s420_s8 = smov 8  }
  0x22   :  { %48 = dma.hbm_to_vmem [thread:$0]  %s475_s3, 2048, %s43_s28, [#allocation6], %s419_s1, %s419_s1, %s420_s8  }
  0x23   :  { %408 = dma.done.wait [#allocation3], 32  }
  0x24   :  { %409 = vsyncadd [#allocation3], 4294967264 }
  0x25   :  { %410 = dma.done.wait [#allocation6], 2560  }
  0x26   :  { %411 = vsyncadd [#allocation6], 4294964736  ;;  %v421_v0 = vmov 0.0   ;;  %v64_v1 = vld [vmem:[#allocation5 + $0x18] sm:$0xff]  ;;  %v63_v2 = vld [vmem:[#allocation5 + $0x10] sm:$0xff]  ;;  %vm77_vm0 = vcmask 130048   ;;  %v67_v22 = vlaneseq }
  0x27   :  { %145 = vmatprep.mubr.f32.mxu0 %v421_v0  ;;  %283 = vmatprep.subr.mxu1 %v421_v0  ;;  %v62_v3 = vld [vmem:[#allocation5 + $0x8] sm:$0xff]  ;;  %v61_v4 = vld [vmem:[#allocation5] sm:$0xff]  ;;  %v169_v5 = vld [vmem:[#allocation7 + $0x78] sm:$0xff]  ;;  %vm422_vm1 = vmmov 0   ;;  %s423_s13 = smov [#allocation8]  }
  0x28   :  { %109 = vmatprep.subr.mxu0 %v64_v1  ;;  %v60_v6 = vld [vmem:[#allocation2] sm:$0x3]  ;;  %284 = vmatpush3.msra.mxu1 %v169_v5  ;;  %v168_v7 = vld [vmem:[#allocation7 + $0x70] sm:$0xff]  ;;  %v167_v8 = vld [vmem:[#allocation7 + $0x68] sm:$0xff]  ;;  %v68_v23 = vshrl.u32 %v67_v22, 7  ;;  %s254_s14 = sshll.u32 %s423_s13, 4  ;;  %s255_s14 = int_to_ptr.vmem [resolvable:$true] %s254_s14 }
  0x29   :  { %110 = vmatpush1.msra.mxu0 %v63_v2  ;;  %285 = vmatprep.subr.mxu1 %v421_v0  ;;  %v166_v9 = vld [vmem:[#allocation7 + $0x60] sm:$0xff]  ;;  %v165_v10 = vld [vmem:[#allocation7 + $0x58] sm:$0xff]  ;;  %v164_v11 = vld [vmem:[#allocation7 + $0x50] sm:$0xff]  ;;  %p393_p2 = scmp.lt.s32.totalorder %s255_s14, %s255_s14 }
  0x2a   :  { %111 = vmatprep.subr.mxu0 %v62_v3  ;;  %286 = vmatpush3.msra.mxu1 %v168_v7  ;;  %v163_v12 = vld [vmem:[#allocation7 + $0x48] sm:$0xff]  ;;  %v162_v13 = vld [vmem:[#allocation7 + $0x40] sm:$0xff]  ;;  %v161_v14 = vld [vmem:[#allocation7 + $0x38] sm:$0xff]  ;;  %v69_v24 = vsub.s32 0, %v68_v23  ;;  %v73_v25 = vsub.s32 1, %v68_v23 }
  0x2b   :  { %112 = vmatpush1.msra.mxu0 %v61_v4  ;;  %287 = vmatprep.subr.mxu1 %v421_v0  ;;  %v160_v15 = vld [vmem:[#allocation7 + $0x30] sm:$0xff]  ;;  %v159_v16 = vld [vmem:[#allocation7 + $0x28] sm:$0xff]  ;;  %v158_v17 = vld [vmem:[#allocation7 + $0x20] sm:$0xff] }
  0x2c   :  { %264 = vmatmul.mubr.msk.f32.vlgmr.msra.gmra.mxu0 %vm77_vm0, %v60_v6  ;;  %288 = vmatpush3.msra.mxu1 %v167_v8  ;;  %v157_v18 = vld [vmem:[#allocation7 + $0x18] sm:$0xff]  ;;  %v156_v19 = vld [vmem:[#allocation7 + $0x10] sm:$0xff]  ;;  %v155_v20 = vld [vmem:[#allocation7 + $0x8] sm:$0xff] }
  0x2d   :  { %289 = vmatprep.subr.mxu1 %v421_v0  ;;  %v154_v21 = vld [vmem:[#allocation7] sm:$0xff]  ;;  %315 = vmatprep.mubr.msk.f32.mxu1 %vm422_vm1, %v421_v0  ;;  %v65_v26 = vld [vmem:[%s474_s2] sm:$0x3]  ;;  %s388_s2 = scalar_lea.vmem %s255_s14, 32 }
  0x2e   :  { %290 = vmatpush3.msra.mxu1 %v166_v9  ;;  %v70_v27 = vrot.slane %v65_v26, %v69_v24  ;;  %v74_v28 = vrot.slane %v65_v26, %v73_v25  ;;  %v265_v35 = vld [vmem:[%s476_s4] ss:$0 sm:$0xff]  ;;  %p389_p1 = scmp.ne.s32.totalorder %s255_s14, %s388_s2  ;;  %p394_p3 = scmp.lt.s32.totalorder %s388_s2, %s388_s2 }
  0x2f   :  { %291 = vmatprep.subr.mxu1 %v421_v0 }
  0x30   :  { %292 = vmatpush3.msra.mxu1 %v165_v10  ;;  %p395_p4 = por %p394_p3, %p393_p2 }
  0x31   :  { %293 = vmatprep.subr.mxu1 %v421_v0 }
  0x32   :  { %294 = vmatpush3.msra.mxu1 %v164_v11  ;;  %p396_p5 = pnand %p395_p4, %p389_p1 }
  0x33   :  { %295 = vmatprep.subr.mxu1 %v421_v0 }
  0x34   :  { %296 = vmatpush3.msra.mxu1 %v163_v12 }
  0x35   :  { %297 = vmatprep.subr.mxu1 %v421_v0 }
  0x36   :  { %298 = vmatpush3.msra.mxu1 %v162_v13 }
  0x37   :  { %299 = vmatprep.subr.mxu1 %v421_v0 }
  0x38   :  { %300 = vmatpush3.msra.mxu1 %v161_v14 }
  0x39   :  { %301 = vmatprep.subr.mxu1 %v421_v0 }
  0x3a   :  { %302 = vmatpush3.msra.mxu1 %v160_v15 }
  0x3b   :  { %303 = vmatprep.subr.mxu1 %v421_v0 }
  0x3c   :  { %304 = vmatpush3.msra.mxu1 %v159_v16 }
  0x3d   :  { %305 = vmatprep.subr.mxu1 %v421_v0 }
  0x3e   :  { %306 = vmatpush3.msra.mxu1 %v158_v17 }
  0x3f   :  { %307 = vmatprep.subr.mxu1 %v421_v0 }
  0x40   :  { %308 = vmatpush3.msra.mxu1 %v157_v18 }
  0x41   :  { %309 = vmatprep.subr.mxu1 %v421_v0 }
  0x42   :  { %310 = vmatpush3.msra.mxu1 %v156_v19 }
  0x43   :  { %311 = vmatprep.subr.mxu1 %v421_v0 }
  0x44   :  { %312 = vmatpush3.msra.mxu1 %v155_v20 }
  0x45   :  { %313 = vmatprep.subr.mxu1 %v421_v0 }
  0x46   :  { %314 = vmatpush3.msra.mxu1 %v154_v21 }
  0xec   :  { %v147_v29 = vpop.f32.mrf.mxu0 }
  0xed   :  { %v148_v31 = vadd.f32 %v147_v29, %v70_v27 }
  0xee   :  { %v149_v30 = vpop.f32.mrf.mxu0 }
  0xef   :  { %v150_v32 = vadd.f32 %v149_v30, %v74_v28 }
  0xf1   :  { %v152_v33 = vmax.f32 %v148_v31, %v150_v32 }
  0xf3   :  { %v153_v34 = vmax.f32 %v152_v33, 0.0 }
  0xf5   :  { %316 = vmatmul.mubr.f32.vlgmr.msra.gmra.mxu1 %v153_v34 }
 0x1b5   :  { %v243_v36 = vpop.f32.mrf.mxu1 }
 0x1b6   :  { %v244_v37 = vadd.f32 %v265_v35, %v243_v36 }
 0x1b7   :  { %v317_v38 = vpop.f32.mrf.mxu1 }
 0x1b8   :  { %247 = vst [vmem:[#allocation8] sm:$0x3] %v244_v37 }
 0x1b9   :  { %399 = shalt.err (!%p396_p5)
}
 0x1ba   :  { %257 = dma.vmem_to_hbm [thread:$0]  %s255_s14, 32, %s477_s5, [#allocation4]  }
 0x1bb   :  { %412 = dma.done.wait [#allocation4], 32  }
 0x1bc   :  { %413 = vsyncadd [#allocation4], 4294967264 }
 0x1bd   :  { %261 = vsyncpa [#allocation3], 1 }
 0x1be   :  { %262 = vsyncpa [#allocation6], 1 }
 0x1bf   :  { %263 = vsyncpa [#allocation4], 1 }

// kernel: tpu_custom_call.1
= control target key start
LH: loop header
LB: loop body
LE: loop exit
PB: predicated region body
PF: predicated region fallthrough
CT: control target
= control target key end

     0   :  { %10 = vsyncpa [#allocation3], 0  ;;  %s472_s0 = inlined_call_operand.hbm [shape: f32[2,16], index: 0, kind: input, shape index: {}]   ;;  %s473_s1 = inlined_call_operand.hbm [shape: f32[16,256], index: 1, kind: input, shape index: {}]   ;;  %s474_s2 = inlined_call_operand.vmem [shape: f32[1,256], index: 2, kind: input, shape index: {}]   ;;  %s475_s3 = inlined_call_operand.hbm [shape: f32[128,128], index: 3, kind: input, shape index: {}]   ;;  %s476_s4 = inlined_call_operand.vmem [shape: f32[1,128], index: 4, kind: input, shape index: {}]   ;;  %s477_s5 = inlined_call_operand.hbm [shape: f32[2,128], index: 5, kind: output, shape index: {}]  }
   0x1   :  { %11 = vsyncpa [#allocation6], 0 }
   0x2   :  { %12 = vsyncpa [#allocation4], 0  ;;  %s414_s18 = smov [#allocation5]  }
   0x3   :  { %s28_s19 = sshll.u32 %s414_s18, 4  ;;  %s29_s19 = int_to_ptr.vmem [resolvable:$true] %s28_s19 }
   0x4   :  { %s336_s20 = scalar_lea.vmem %s29_s19, 512  ;;  %p341_p1 = scmp.lt.s32.totalorder %s29_s19, %s29_s19 }
   0x5   :  { %p337_p0 = scmp.ne.s32.totalorder %s29_s19, %s336_s20  ;;  %p342_p2 = scmp.lt.s32.totalorder %s336_s20, %s336_s20 }
   0x7   :  { %p343_p3 = por %p342_p2, %p341_p1 }
   0x9   :  { %p344_p4 = pnand %p343_p3, %p337_p0 }
   0xb   :  { %347 = shalt.err (!%p344_p4)
}
   0xc   :  { %s415_s21 = smov 256   ;;  %s416_s22 = smov 16  }
   0xd   :  { %34 = dma.hbm_to_vmem [thread:$0]  %s473_s1, 512, %s29_s19, [#allocation6], %s415_s21, %s415_s21, %s416_s22  }
   0xe   :  { %s417_s25 = smov [#allocation2]   ;;  %s418_s27 = smov [#allocation7]  }
   0xf   :  { %s19_s26 = sshll.u32 %s417_s25, 4  ;;  %s42_s28 = sshll.u32 %s418_s27, 4  ;;  %s20_s26 = int_to_ptr.vmem [resolvable:$true] %s19_s26  ;;  %s43_s28 = int_to_ptr.vmem [resolvable:$true] %s42_s28 }
  0x10   :  { %s356_s29 = scalar_lea.vmem %s20_s26, 32  ;;  %p361_p6 = scmp.lt.s32.totalorder %s20_s26, %s20_s26 }
  0x11   :  { %p357_p5 = scmp.ne.s32.totalorder %s20_s26, %s356_s29  ;;  %p362_p7 = scmp.lt.s32.totalorder %s356_s29, %s356_s29 }
  0x13   :  { %p363_p8 = por %p362_p7, %p361_p6 }
  0x15   :  { %p364_p9 = pnand %p363_p8, %p357_p5 }
  0x17   :  { %367 = shalt.err (!%p364_p9)
}
  0x18   :  { %22 = dma.hbm_to_vmem [thread:$0]  %s472_s0, 32, %s20_s26, [#allocation3]  }
  0x19   :  { %s376_s7 = scalar_lea.vmem %s43_s28, 2048  ;;  %p381_p11 = scmp.lt.s32.totalorder %s43_s28, %s43_s28 }
  0x1a   :  { %p377_p10 = scmp.ne.s32.totalorder %s43_s28, %s376_s7  ;;  %p382_p12 = scmp.lt.s32.totalorder %s376_s7, %s376_s7 }
  0x1c   :  { %p383_p13 = por %p382_p12, %p381_p11 }
  0x1e   :  { %p384_p0 = pnand %p383_p13, %p377_p10 }
  0x20   :  { %387 = shalt.err (!%p384_p0)
}
  0x21   :  { %s419_s1 = smov 128   ;;  %s420_s8 = smov 8  }
  0x22   :  { %48 = dma.hbm_to_vmem [thread:$0]  %s475_s3, 2048, %s43_s28, [#allocation6], %s419_s1, %s419_s1, %s420_s8  }
  0x23   :  { %408 = dma.done.wait [#allocation3], 32  }
  0x24   :  { %409 = vsyncadd [#allocation3], 4294967264 }
  0x25   :  { %410 = dma.done.wait [#allocation6], 2560  }
  0x26   :  { %411 = vsyncadd [#allocation6], 4294964736  ;;  %v421_v0 = vmov 0.0   ;;  %v64_v1 = vld [vmem:[#allocation5 + $0x18] sm:$0xff]  ;;  %v63_v2 = vld [vmem:[#allocation5 + $0x10] sm:$0xff]  ;;  %vm77_vm0 = vcmask 130048   ;;  %v67_v22 = vlaneseq }
  0x27   :  { %145 = vmatprep.mubr.f32.mxu0 %v421_v0  ;;  %283 = vmatprep.subr.mxu1 %v421_v0  ;;  %v62_v3 = vld [vmem:[#allocation5 + $0x8] sm:$0xff]  ;;  %v61_v4 = vld [vmem:[#allocation5] sm:$0xff]  ;;  %v169_v5 = vld [vmem:[#allocation7 + $0x78] sm:$0xff]  ;;  %vm422_vm1 = vmmov 0   ;;  %s423_s13 = smov [#allocation8]  }
  0x28   :  { %109 = vmatprep.subr.mxu0 %v64_v1  ;;  %v60_v6 = vld [vmem:[#allocation2] sm:$0x3]  ;;  %284 = vmatpush3.msra.mxu1 %v169_v5  ;;  %v168_v7 = vld [vmem:[#allocation7 + $0x70] sm:$0xff]  ;;  %v167_v8 = vld [vmem:[#allocation7 + $0x68] sm:$0xff]  ;;  %v68_v23 = vshrl.u32 %v67_v22, 7  ;;  %s254_s14 = sshll.u32 %s423_s13, 4  ;;  %s255_s14 = int_to_ptr.vmem [resolvable:$true] %s254_s14 }
  0x29   :  { %110 = vmatpush1.msra.mxu0 %v63_v2  ;;  %285 = vmatprep.subr.mxu1 %v421_v0  ;;  %v166_v9 = vld [vmem:[#allocation7 + $0x60] sm:$0xff]  ;;  %v165_v10 = vld [vmem:[#allocation7 + $0x58] sm:$0xff]  ;;  %v164_v11 = vld [vmem:[#allocation7 + $0x50] sm:$0xff]  ;;  %p393_p2 = scmp.lt.s32.totalorder %s255_s14, %s255_s14 }
  0x2a   :  { %111 = vmatprep.subr.mxu0 %v62_v3  ;;  %286 = vmatpush3.msra.mxu1 %v168_v7  ;;  %v163_v12 = vld [vmem:[#allocation7 + $0x48] sm:$0xff]  ;;  %v162_v13 = vld [vmem:[#allocation7 + $0x40] sm:$0xff]  ;;  %v161_v14 = vld [vmem:[#allocation7 + $0x38] sm:$0xff]  ;;  %v69_v24 = vsub.s32 0, %v68_v23  ;;  %v73_v25 = vsub.s32 1, %v68_v23 }
  0x2b   :  { %112 = vmatpush1.msra.mxu0 %v61_v4  ;;  %287 = vmatprep.subr.mxu1 %v421_v0  ;;  %v160_v15 = vld [vmem:[#allocation7 + $0x30] sm:$0xff]  ;;  %v159_v16 = vld [vmem:[#allocation7 + $0x28] sm:$0xff]  ;;  %v158_v17 = vld [vmem:[#allocation7 + $0x20] sm:$0xff] }
  0x2c   :  { %264 = vmatmul.mubr.msk.f32.vlgmr.msra.gmra.mxu0 %vm77_vm0, %v60_v6  ;;  %288 = vmatpush3.msra.mxu1 %v167_v8  ;;  %v157_v18 = vld [vmem:[#allocation7 + $0x18] sm:$0xff]  ;;  %v156_v19 = vld [vmem:[#allocation7 + $0x10] sm:$0xff]  ;;  %v155_v20 = vld [vmem:[#allocation7 + $0x8] sm:$0xff] }
  0x2d   :  { %289 = vmatprep.subr.mxu1 %v421_v0  ;;  %v154_v21 = vld [vmem:[#allocation7] sm:$0xff]  ;;  %315 = vmatprep.mubr.msk.f32.mxu1 %vm422_vm1, %v421_v0  ;;  %v65_v26 = vld [vmem:[%s474_s2] sm:$0x3]  ;;  %s388_s2 = scalar_lea.vmem %s255_s14, 32 }
  0x2e   :  { %290 = vmatpush3.msra.mxu1 %v166_v9  ;;  %v70_v27 = vrot.slane %v65_v26, %v69_v24  ;;  %v74_v28 = vrot.slane %v65_v26, %v73_v25  ;;  %v265_v35 = vld [vmem:[%s476_s4] ss:$0 sm:$0xff]  ;;  %p389_p1 = scmp.ne.s32.totalorder %s255_s14, %s388_s2  ;;  %p394_p3 = scmp.lt.s32.totalorder %s388_s2, %s388_s2 }
  0x2f   :  { %291 = vmatprep.subr.mxu1 %v421_v0 }
  0x30   :  { %292 = vmatpush3.msra.mxu1 %v165_v10  ;;  %p395_p4 = por %p394_p3, %p393_p2 }
  0x31   :  { %293 = vmatprep.subr.mxu1 %v421_v0 }
  0x32   :  { %294 = vmatpush3.msra.mxu1 %v164_v11  ;;  %p396_p5 = pnand %p395_p4, %p389_p1 }
  0x33   :  { %295 = vmatprep.subr.mxu1 %v421_v0 }
  0x34   :  { %296 = vmatpush3.msra.mxu1 %v163_v12 }
  0x35   :  { %297 = vmatprep.subr.mxu1 %v421_v0 }
  0x36   :  { %298 = vmatpush3.msra.mxu1 %v162_v13 }
  0x37   :  { %299 = vmatprep.subr.mxu1 %v421_v0 }
  0x38   :  { %300 = vmatpush3.msra.mxu1 %v161_v14 }
  0x39   :  { %301 = vmatprep.subr.mxu1 %v421_v0 }
  0x3a   :  { %302 = vmatpush3.msra.mxu1 %v160_v15 }
  0x3b   :  { %303 = vmatprep.subr.mxu1 %v421_v0 }
  0x3c   :  { %304 = vmatpush3.msra.mxu1 %v159_v16 }
  0x3d   :  { %305 = vmatprep.subr.mxu1 %v421_v0 }
  0x3e   :  { %306 = vmatpush3.msra.mxu1 %v158_v17 }
  0x3f   :  { %307 = vmatprep.subr.mxu1 %v421_v0 }
  0x40   :  { %308 = vmatpush3.msra.mxu1 %v157_v18 }
  0x41   :  { %309 = vmatprep.subr.mxu1 %v421_v0 }
  0x42   :  { %310 = vmatpush3.msra.mxu1 %v156_v19 }
  0x43   :  { %311 = vmatprep.subr.mxu1 %v421_v0 }
  0x44   :  { %312 = vmatpush3.msra.mxu1 %v155_v20 }
  0x45   :  { %313 = vmatprep.subr.mxu1 %v421_v0 }
  0x46   :  { %314 = vmatpush3.msra.mxu1 %v154_v21 }
  0xec   :  { %v147_v29 = vpop.f32.mrf.mxu0 }
  0xed   :  { %v148_v31 = vadd.f32 %v147_v29, %v70_v27 }
  0xee   :  { %v149_v30 = vpop.f32.mrf.mxu0 }
  0xef   :  { %v150_v32 = vadd.f32 %v149_v30, %v74_v28 }
  0xf1   :  { %v152_v33 = vmax.f32 %v148_v31, %v150_v32 }
  0xf3   :  { %v153_v34 = vmax.f32 %v152_v33, 0.0 }
  0xf5   :  { %316 = vmatmul.mubr.f32.vlgmr.msra.gmra.mxu1 %v153_v34 }
 0x1b5   :  { %v243_v36 = vpop.f32.mrf.mxu1 }
 0x1b6   :  { %v244_v37 = vadd.f32 %v265_v35, %v243_v36 }
 0x1b7   :  { %v317_v38 = vpop.f32.mrf.mxu1 }
 0x1b8   :  { %247 = vst [vmem:[#allocation8] sm:$0x3] %v244_v37 }
 0x1b9   :  { %399 = shalt.err (!%p396_p5)
}
 0x1ba   :  { %257 = dma.vmem_to_hbm [thread:$0]  %s255_s14, 32, %s477_s5, [#allocation4]  }
 0x1bb   :  { %412 = dma.done.wait [#allocation4], 32  }
 0x1bc   :  { %413 = vsyncadd [#allocation4], 4294967264 }
 0x1bd   :  { %261 = vsyncpa [#allocation3], 1 }
 0x1be   :  { %262 = vsyncpa [#allocation6], 1 }
 0x1bf   :  { %263 = vsyncpa [#allocation4], 1 }

</bundles_post_ra>
